<compile_context>
chip_gen: v7x
topology: tpu7x:2x2x1
jax: 0.10.0
libtpu: 0.0.40
codegen_flags: <defaults>
</compile_context>

<pallas_src>
import functools

import jax
import jax.numpy as jnp
from jax.experimental import pallas as pl
from jax.experimental.pallas import tpu as pltpu


def spmm_kernel(adj_ref, emb_ref, out_ref, acc_ref):
    # Accumulate adj_tile @ emb_tile over the k (contraction) grid axis.
    @pl.when(pl.program_id(2) == 0)
    def _init():
        acc_ref[...] = jnp.zeros_like(acc_ref)

    acc_ref[...] += jnp.dot(adj_ref[...], emb_ref[...],
                            preferred_element_type=jnp.float32)

    @pl.when(pl.program_id(2) == pl.num_programs(2) - 1)
    def _finalize():
        out_ref[...] = acc_ref[...].astype(out_ref.dtype)


@functools.partial(jax.jit, static_argnames=("n_nodes", "tm", "tn", "tk"))
def gcn_layer(adj_rows, adj_cols, adj_vals, embeds, *, n_nodes,
              tm=128, tn=128, tk=128):
    """out = spmm(adj, embeds) with adj given as COO (rows, cols, vals)."""
    M = n_nodes                    # rows of adj
    K, D = embeds.shape            # cols of adj == rows of embeds, feature dim

    # Pad every dimension up to a lane/sublane-aligned tile multiple so the
    # kernel only ever sees dense (128, 128) blocks.
    Mp = pl.cdiv(M, tm) * tm
    Kp = pl.cdiv(K, tk) * tk
    Dp = pl.cdiv(D, tn) * tn

    # Densify the sparse COO adjacency directly at the padded shape
    # (plain-JAX glue; duplicate (row, col) entries accumulate like t.spmm).
    # TODO(synk): for graphs where the densified [N, N] adjacency cannot fit
    # in HBM, switch to a CSR / scalar-prefetch segment-sum kernel instead.
    adj = jnp.zeros((Mp, Kp), jnp.float32).at[adj_rows, adj_cols].add(
        adj_vals.astype(jnp.float32))
    emb = jnp.zeros((Kp, Dp), jnp.float32).at[:K, :D].set(
        embeds.astype(jnp.float32))

    out = pl.pallas_call(
        spmm_kernel,
        out_shape=jax.ShapeDtypeStruct((Mp, Dp), jnp.float32),
        grid_spec=pltpu.PrefetchScalarGridSpec(
            num_scalar_prefetch=0,
            grid=(Mp // tm, Dp // tn, Kp // tk),
            in_specs=[
                pl.BlockSpec((tm, tk), lambda i, j, k: (i, k)),
                pl.BlockSpec((tk, tn), lambda i, j, k: (k, j)),
            ],
            out_specs=pl.BlockSpec((tm, tn), lambda i, j, k: (i, j)),
            scratch_shapes=[pltpu.VMEM((tm, tn), jnp.float32)],
        ),
        compiler_params=pltpu.CompilerParams(
            dimension_semantics=("parallel", "parallel", "arbitrary"),
            vmem_limit_bytes=32 * 1024 * 1024,
        ),
    )(adj, emb)

    return out[:M, :D]


def gcn_layer_ref(adj_rows, adj_cols, adj_vals, embeds, n_nodes):
    # Pure-JAX reference for t.spmm(adj, embeds) with a sparse COO adj.
    contrib = adj_vals[:, None] * embeds[adj_cols]
    return jax.ops.segment_sum(contrib, adj_rows, num_segments=n_nodes)


if __name__ == "__main__":
    N_NODES = 256
    LATDIM = 128
    N_EDGES = 2048

    key = jax.random.PRNGKey(0)
    k_r, k_c, k_v, k_e = jax.random.split(key, 4)

    rows = jax.random.randint(k_r, (N_EDGES,), 0, N_NODES)
    cols = jax.random.randint(k_c, (N_EDGES,), 0, N_NODES)
    vals = jax.random.uniform(k_v, (N_EDGES,), jnp.float32)      # edge weights
    embeds = jax.random.normal(k_e, (N_NODES, LATDIM), jnp.float32) * 0.1

    out = gcn_layer(rows, cols, vals, embeds, n_nodes=N_NODES)
    jax.block_until_ready(out)

    ref = gcn_layer_ref(rows, cols, vals, embeds, N_NODES)
    assert out.shape == (N_NODES, LATDIM)
    assert jnp.allclose(out, ref, rtol=1e-3, atol=1e-3), "mismatch vs reference"

    print("KERNEL_OK")
</pallas_src>

<mosaic_0001>
module attributes {stable_mosaic.version = 11 : i64} {
  func.func private @main(%arg0: i32) attributes {dimension_semantics = [#tpu.dimension_semantics<core_parallel>], iteration_bounds = array<i64: 2>, tpu.core_type = #tpu.core_type<sc_scalar_subcore>, window_params = []} {
    return
  }
}

module attributes {stable_mosaic.version = 11 : i64} {
  func.func private @main(%arg0: i32) attributes {dimension_semantics = [#tpu.dimension_semantics<core_parallel>], iteration_bounds = array<i64: 2>, tpu.core_type = #tpu.core_type<sc_scalar_subcore>, window_params = []} {
    return
  }
}

module attributes {stable_mosaic.version = 11 : i64} {
  func.func @spmm_kernel(%arg0: i32, %arg1: i32, %arg2: i32, %arg3: memref<128x128xf32, #tpu.memory_space<vmem>>, %arg4: memref<128x128xf32, #tpu.memory_space<vmem>>, %arg5: memref<128x128xf32, #tpu.memory_space<vmem>>, %arg6: memref<128x128xf32, #tpu.memory_space<vmem>>) attributes {dimension_semantics = [#tpu.dimension_semantics<parallel>, #tpu.dimension_semantics<parallel>, #tpu.dimension_semantics<arbitrary>], iteration_bounds = array<i64: 2, 1, 2>, scalar_prefetch = 0 : i64, scratch_operands = 1 : i64, tpu.core_type = #tpu.core_type<tc>, window_params = [{transform_indices = @transform_0, window_bounds = array<i64: 128, 128>}, {transform_indices = @transform_1, window_bounds = array<i64: 128, 128>}, {transform_indices = @transform_2, window_bounds = array<i64: 128, 128>}]} {
    %c0_i32 = arith.constant 0 : i32
    %0 = arith.cmpi eq, %arg2, %c0_i32 : i32
    %1 = arith.extui %0 : i1 to i32
    %c0_i32_0 = arith.constant 0 : i32
    %2 = arith.cmpi ne, %1, %c0_i32_0 : i32
    scf.if %2 {
      %cst_9 = arith.constant 0.000000e+00 : f32
      %12 = vector.broadcast %cst_9 : f32 to vector<128x128xf32>
      %c0_10 = arith.constant 0 : index
      %c0_11 = arith.constant 0 : index
      %13 = vector.load %arg6[%c0_10, %c0_11] : memref<128x128xf32, #tpu.memory_space<vmem>>, vector<128x128xf32>
      tpu.vector_store %arg6[%c0_10, %c0_11], %12 {strides = array<i32>} : memref<128x128xf32, #tpu.memory_space<vmem>>, vector<128x128xf32>,
    } else {
    }
    %c0 = arith.constant 0 : index
    %c0_1 = arith.constant 0 : index
    %3 = vector.load %arg6[%c0, %c0_1] : memref<128x128xf32, #tpu.memory_space<vmem>>, vector<128x128xf32>
    %c0_2 = arith.constant 0 : index
    %c0_3 = arith.constant 0 : index
    %4 = vector.load %arg3[%c0_2, %c0_3] : memref<128x128xf32, #tpu.memory_space<vmem>>, vector<128x128xf32>
    %c0_4 = arith.constant 0 : index
    %c0_5 = arith.constant 0 : index
    %5 = vector.load %arg4[%c0_4, %c0_5] : memref<128x128xf32, #tpu.memory_space<vmem>>, vector<128x128xf32>
    %cst = arith.constant dense<0.000000e+00> : vector<128x128xf32>
    %6 = tpu.matmul %4, %5, %cst {dimension_numbers = #tpu.dot_dimension_numbers<[1], [0], [0], [1], [0, 0, 1, 1], [], []>} : vector<128x128xf32>, vector<128x128xf32>, vector<128x128xf32> -> vector<128x128xf32>
    %7 = arith.addf %3, %6 : vector<128x128xf32>
    %c0_6 = arith.constant 0 : index
    %c0_7 = arith.constant 0 : index
    %8 = vector.load %arg6[%c0_6, %c0_7] : memref<128x128xf32, #tpu.memory_space<vmem>>, vector<128x128xf32>
    tpu.vector_store %arg6[%c0_6, %c0_7], %7 {strides = array<i32>} : memref<128x128xf32, #tpu.memory_space<vmem>>, vector<128x128xf32>,
    %c1_i32 = arith.constant 1 : i32
    %9 = arith.cmpi eq, %arg2, %c1_i32 : i32
    %10 = arith.extui %9 : i1 to i32
    %c0_i32_8 = arith.constant 0 : i32
    %11 = arith.cmpi ne, %10, %c0_i32_8 : i32
    scf.if %11 {
      %c0_9 = arith.constant 0 : index
      %c0_10 = arith.constant 0 : index
      %12 = vector.load %arg6[%c0_9, %c0_10] : memref<128x128xf32, #tpu.memory_space<vmem>>, vector<128x128xf32>
      %c0_11 = arith.constant 0 : index
      %c0_12 = arith.constant 0 : index
      %13 = vector.load %arg5[%c0_11, %c0_12] : memref<128x128xf32, #tpu.memory_space<vmem>>, vector<128x128xf32>
      tpu.vector_store %arg5[%c0_11, %c0_12], %12 {strides = array<i32>} : memref<128x128xf32, #tpu.memory_space<vmem>>, vector<128x128xf32>,
    } else {
    }
    return
  }
  func.func @transform_0(%arg0: i32, %arg1: i32, %arg2: i32) -> (i32, i32) {
    %c0_i32 = arith.constant 0 : i32
    return %arg0, %arg2 : i32, i32
  }
  func.func @transform_1(%arg0: i32, %arg1: i32, %arg2: i32) -> (i32, i32) {
    %c0_i32 = arith.constant 0 : i32
    return %arg2, %arg1 : i32, i32
  }
  func.func @transform_2(%arg0: i32, %arg1: i32, %arg2: i32) -> (i32, i32) {
    %c0_i32 = arith.constant 0 : i32
    return %arg0, %arg1 : i32, i32
  }
}

</mosaic_0001>

<bundles_post_ra>
// kernel: gcn_layer.1
= control target key start
LH: loop header
LB: loop body
LE: loop exit
PB: predicated region body
PF: predicated region fallthrough
CT: control target
= control target key end

     0   :  { %7 = vsyncpa [#allocation5], 0  ;;  %s1325_s0 = inlined_call_operand.vmem [shape: f32[256,256], index: 0, kind: input, shape index: {}]   ;;  %s1326_s1 = inlined_call_operand.vmem [shape: f32[256,128], index: 1, kind: input, shape index: {}]   ;;  %s1327_s2 = inlined_call_operand.hbm [shape: f32[256,128], index: 2, kind: output, shape index: {}]  }
   0x1   :  { %9 = vsyncpa [#allocation5 + $0x1], 0  ;;  %s1073_s9 = smov 0   ;;  %s1075_s10 = smov 0  }
   0x2   :  { %s1077_s11 = smov 0   ;;  %s1079_s12 = smov 0  }
   0x3   :  { %s1081_s13 = smov 0   ;;  %s1083_s14 = smov 0  }
   0x4   :  { %s1085_s15 = smov 0   ;;  %s1087_s16 = smov 0  }
   0x5   :  { %s1089_s17 = smov 0   ;;  %s1091_s18 = smov 0  }
   0x6 LB: > { %s694_s19 = sadd.s32 4294967295, %s1052_s18   ;;  %s695_s20 = sadd.s32 4294967294, %s1052_s18   ;;  %s1052_s18 = sphi %s1091_s18, %s15_s18   ;;  %s1048_s17 = sphi %s1089_s17, %s1339_s17   ;;  %s1044_s16 = sphi %s1087_s16, %s1338_s16   ;;  %s1040_s15 = sphi %s1085_s15, %s1337_s15   ;;  %s1036_s14 = sphi %s1083_s14, %s1336_s14   ;;  %s1032_s13 = sphi %s1081_s13, %s1335_s13   ;;  %s1028_s12 = sphi %s1079_s12, %s1334_s12   ;;  %s1024_s11 = sphi %s1077_s11, %s1333_s11   ;;  %s1020_s10 = sphi %s1075_s10, %s1332_s10   ;;  %s1016_s9 = sphi %s1073_s9, %s1331_s9  }
   0x7   : > { %s27_s21 = sadd.s32 1, %s1044_s16  ;;  %s34_s22 = sadd.s32 1, %s1048_s17 }
   0x8   : > { %p28_p0 = scmp.ge.s32.totalorder %s27_s21, 2  ;;  %s43_s23 = sadd.s32 1, %s1032_s13 }
   0x9   : > { %p50_p1 = scmp.ne.s32.totalorder %s1032_s13, %s1028_s12  ;;  %p51_p2 = scmp.eq.s32.totalorder %s1052_s18, 0 }
   0xa   : > { %s1341_s21 = smov (%p28_p0, %s27_s21), 0  ;;  %s1343_s22 = smov (!%p28_p0, %s34_s22), %s1048_s17 }
   0xb   : > { %s39_s24 = ssub.s32 %s1044_s16, %s1341_s21  ;;  %p1136_p3 = por %p51_p2, %p50_p1 }
   0xc   : > { %p36_p4 = scmp.ge.s32.totalorder %s1343_s22, 2  ;;  %s99_s26 = sadd.s32 1, %s1024_s11 }
   0xd   : > { %p109_p5 = scmp.ne.s32.totalorder %s1024_s11, %s1020_s10  ;;  %p110_p6 = scmp.eq.s32.totalorder %s694_s19, 3 }
   0xe   : > { %s1345_s22 = smov (%p36_p4, %s1343_s22), 0  ;;  %p115_p8 = scmp.ne.s32.totalorder %s1020_s10, %s1016_s9 }
   0xf   : > { %p1145_p7 = por %p110_p6, %p109_p5  ;;  %s38_s28 = ssub.s32 %s1048_s17, %s1345_s22 }
  0x10   : > { %p116_p9 = scmp.eq.s32.totalorder %s695_s20, 3  ;;  %s40_s29 = sor.u32 %s39_s24, %s38_s28 }
  0x11   : > { %p97_p10 = scmp.eq.s32.totalorder %s38_s28, 0  ;;  %p41_p11 = scmp.eq.s32.totalorder %s40_s29, 0 }
  0x12   : > { %p1153_p12 = por %p116_p9, %p115_p8  ;;  %p697_p13 = scmp.ge.s32.totalorder %s1052_s18, 4 }
  0x13   : > { %s1158_s3 = scalar_select %p97_p10, %s1024_s11, %s99_s26  }
  0x14   : > { %s1161_s4 = scalar_select %p41_p11, %s1032_s13, %s43_s23  }
  0x15   : > { %132 = sbr.rel (%p697_p13) target bundleno = 42 (0x2a), region = 16 }
  0x1c   : > { %135 = sbr.rel (!%p1136_p3) target bundleno = 42 (0x2a), region = 20  ;;  %s137_s5 = sand.u32 (%p1136_p3), 1, %s1032_s13  }
  0x1d   : > { %s714_s6 = sshll.u32 (%p1136_p3), %s1048_s17, 5  ;;  %s698_s7 = sshll.u32 (%p1136_p3), %s137_s5, 7 }
  0x1e   : > { %s142_s8 = sadd.s32 (%p1136_p3), %s1044_s16, %s714_s6  ;;  %s139_s23 = scalar_lea.vmem (%p1136_p3), [#allocation3], %s698_s7 }
  0x1f   : > { %s701_s19 = sshll.u32 (%p1136_p3), %s142_s8, 3 }
  0x20   : > { %s1172_s26 = scalar_lea.vmem (%p1136_p3), %s1325_s0, %s701_s19 }
  0x21   : > { %v202_v0 = vld [vmem:[%s1172_s26] sm:$0xff] (%p1136_p3)  ;;  %v204_v1 = vld [vmem:[%s1172_s26 + $0x10] sm:$0xff] (%p1136_p3) }
  0x22   : > { %v206_v2 = vld [vmem:[%s1172_s26 + $0x20] sm:$0xff] (%p1136_p3)  ;;  %203 = vst [vmem:[%s139_s23] sm:$0xff] (%p1136_p3), %v202_v0  ;;  %205 = vst [vmem:[%s139_s23 + $0x8] sm:$0xff] (%p1136_p3), %v204_v1  ;;  %v208_v3 = vld [vmem:[%s1172_s26 + $0x30] sm:$0xff] (%p1136_p3) }
  0x23   : > { %207 = vst [vmem:[%s139_s23 + $0x10] sm:$0xff] %v206_v2  ;;  %v210_v4 = vld [vmem:[%s1172_s26 + $0x40] sm:$0xff]  ;;  %v212_v5 = vld [vmem:[%s1172_s26 + $0x50] sm:$0xff]  ;;  %209 = vst [vmem:[%s139_s23 + $0x18] sm:$0xff] %v208_v3 }
  0x24   : > { %211 = vst [vmem:[%s139_s23 + $0x20] sm:$0xff] %v210_v4  ;;  %213 = vst [vmem:[%s139_s23 + $0x28] sm:$0xff] %v212_v5  ;;  %v214_v6 = vld [vmem:[%s1172_s26 + $0x60] sm:$0xff]  ;;  %v216_v7 = vld [vmem:[%s1172_s26 + $0x70] sm:$0xff] }
  0x25   : > { %v218_v8 = vld [vmem:[%s1172_s26 + $0x80] sm:$0xff]  ;;  %215 = vst [vmem:[%s139_s23 + $0x30] sm:$0xff] %v214_v6  ;;  %217 = vst [vmem:[%s139_s23 + $0x38] sm:$0xff] %v216_v7  ;;  %v220_v9 = vld [vmem:[%s1172_s26 + $0x90] sm:$0xff] }
  0x26   : > { %219 = vst [vmem:[%s139_s23 + $0x40] sm:$0xff] %v218_v8  ;;  %v222_v10 = vld [vmem:[%s1172_s26 + $0xa0] sm:$0xff]  ;;  %v224_v11 = vld [vmem:[%s1172_s26 + $0xb0] sm:$0xff]  ;;  %221 = vst [vmem:[%s139_s23 + $0x48] sm:$0xff] %v220_v9 }
  0x27   : > { %223 = vst [vmem:[%s139_s23 + $0x50] sm:$0xff] %v222_v10  ;;  %225 = vst [vmem:[%s139_s23 + $0x58] sm:$0xff] %v224_v11  ;;  %v226_v12 = vld [vmem:[%s1172_s26 + $0xc0] sm:$0xff]  ;;  %v228_v13 = vld [vmem:[%s1172_s26 + $0xd0] sm:$0xff] }
  0x28   : > { %v230_v14 = vld [vmem:[%s1172_s26 + $0xe0] sm:$0xff]  ;;  %227 = vst [vmem:[%s139_s23 + $0x60] sm:$0xff] %v226_v12  ;;  %229 = vst [vmem:[%s139_s23 + $0x68] sm:$0xff] %v228_v13  ;;  %v232_v15 = vld [vmem:[%s1172_s26 + $0xf0] sm:$0xff] }
  0x29   : > { %231 = vst [vmem:[%s139_s23 + $0x70] sm:$0xff] %v230_v14  ;;  %233 = vst [vmem:[%s139_s23 + $0x78] sm:$0xff] %v232_v15 }
  0x2a PF: > { %p702_p0 = scmp.ge.s32.totalorder %s1052_s18, 1  ;;  %p250_p1 = scmp.lt.s32.totalorder %s1052_s18, 5 }
  0x2c   : > { %p251_p2 = pnand %p702_p0, %p250_p1 }
  0x2d   : > { %s257_s25 = sand.u32 (!%p251_p2), 1, %s1028_s12   ;;  %s283_s28 = sand.u32 (!%p251_p2), 1, %s1020_s10  }
  0x2e   : > { %254 = sbr.rel (%p251_p2) target bundleno = 360 (0x168), region = 62  ;;  %s703_s29 = sshll.u32 (!%p251_p2), %s257_s25, 7 }
  0x2f   : > { %s704_s5 = sshll.u32 (!%p251_p2), %s283_s28, 7  ;;  %s705_s6 = sshll.u32 (!%p251_p2), %s1036_s14, 4 }
  0x30   : > { %p288_p3 = scmp.lt.s32.totalorder (!%p251_p2), %s705_s6, 31  ;;  %s1202_s24 = scalar_lea.vmem (!%p251_p2), [#allocation3], %s703_s29 }
  0x31   : > { %s1204_s26 = scalar_lea.vmem (!%p251_p2), [#allocation4], %s704_s5  ;;  %p707_p4 = scmp.ne.s32.totalorder (!%p251_p2), %s1036_s14, 0 }
  0x35   : > { %s1347_s6 = smov (!%p288_p3, %s705_s6), 31  ;;  %300 = sbr.rel (%p707_p4) target bundleno = 63 (0x3f), region = 70 }
  0x36   : > { %s706_s7 = sshll.u32 %s1347_s6, 3  ;;  %v1054_v16 = vmov (!%p707_p4), 0.0  }
  0x37   : > { %s1200_s20 = scalar_lea.vmem %s1326_s1, %s706_s7  ;;  %301 = vst [vmem:[#allocation2] sm:$0xff] (!%p707_p4), %v1054_v16  ;;  %302 = vst [vmem:[#allocation2 + $0x8] sm:$0xff] (!%p707_p4), %v1054_v16 }
  0x38   : > { %303 = vst [vmem:[#allocation2 + $0x10] sm:$0xff] (!%p707_p4), %v1054_v16  ;;  %304 = vst [vmem:[#allocation2 + $0x18] sm:$0xff] (!%p707_p4), %v1054_v16 }
  0x39   : > { %305 = vst [vmem:[#allocation2 + $0x20] sm:$0xff] (!%p707_p4), %v1054_v16  ;;  %306 = vst [vmem:[#allocation2 + $0x28] sm:$0xff] (!%p707_p4), %v1054_v16 }
  0x3a   : > { %307 = vst [vmem:[#allocation2 + $0x30] sm:$0xff] (!%p707_p4), %v1054_v16  ;;  %308 = vst [vmem:[#allocation2 + $0x38] sm:$0xff] (!%p707_p4), %v1054_v16 }
  0x3b   : > { %309 = vst [vmem:[#allocation2 + $0x40] sm:$0xff] (!%p707_p4), %v1054_v16  ;;  %310 = vst [vmem:[#allocation2 + $0x48] sm:$0xff] (!%p707_p4), %v1054_v16 }
  0x3c   : > { %311 = vst [vmem:[#allocation2 + $0x50] sm:$0xff] %v1054_v16  ;;  %312 = vst [vmem:[#allocation2 + $0x58] sm:$0xff] %v1054_v16 }
  0x3d   : > { %313 = vst [vmem:[#allocation2 + $0x60] sm:$0xff] %v1054_v16  ;;  %314 = vst [vmem:[#allocation2 + $0x68] sm:$0xff] %v1054_v16 }
  0x3e   : > { %315 = vst [vmem:[#allocation2 + $0x70] sm:$0xff] %v1054_v16  ;;  %316 = vst [vmem:[#allocation2 + $0x78] sm:$0xff] %v1054_v16 }
  0x3f PF: > { %v349_v17 = vld [vmem:[%s1200_s20] sm:$0xff]  ;;  %v350_v18 = vld [vmem:[%s1200_s20 + $0x8] sm:$0xff]  ;;  %v351_v19 = vld [vmem:[%s1200_s20 + $0x10] sm:$0xff]  ;;  %p708_p5 = scmp.ne.s32.totalorder %s1036_s14, 1 }
  0x40   : > { %v804_v20 = vpack.c.bf16 %v350_v18, %v349_v17  ;;  %v352_v21 = vld [vmem:[%s1200_s20 + $0x18] sm:$0xff]  ;;  %v353_v23 = vld [vmem:[%s1200_s20 + $0x20] sm:$0xff]  ;;  %v354_v24 = vld [vmem:[%s1200_s20 + $0x28] sm:$0xff] }
  0x41   : > { %v808_v22 = vpack.c.bf16 %v352_v21, %v351_v19  ;;  %v812_v25 = vpack.c.bf16 %v354_v24, %v353_v23  ;;  %v333_v26 = vld [vmem:[%s1202_s24] sm:$0xff]  ;;  %v355_v28 = vld [vmem:[%s1200_s20 + $0x30] sm:$0xff]  ;;  %v356_v29 = vld [vmem:[%s1200_s20 + $0x38] sm:$0xff] }
  0x42   : > { %805 = vmatprep.subr.bf16.mxu0 %v804_v20  ;;  %836 = vmatprep.subr.bf16.mxu1 %v804_v20  ;;  %v341_v27 = vld [vmem:[%s1202_s24 + $0x40] sm:$0xff]  ;;  %v816_v30 = vpack.c.bf16 %v356_v29, %v355_v28  ;;  %v358_v32 = vld [vmem:[%s1200_s20 + $0x48] sm:$0xff]  ;;  %v359_v34 = vld [vmem:[%s1200_s20 + $0x50] sm:$0xff] }
  0x43   : > { %807 = vmatpush3.bf16.msra.mxu0 %v804_v20  ;;  %844 = vmatpush3.bf16.msra.mxu1 %v804_v20  ;;  %v357_v31 = vld [vmem:[%s1200_s20 + $0x40] sm:$0xff]  ;;  %v360_v35 = vld [vmem:[%s1200_s20 + $0x58] sm:$0xff]  ;;  %v362_v38 = vld [vmem:[%s1200_s20 + $0x68] sm:$0xff] }
  0x44   : > { %809 = vmatprep.subr.bf16.mxu0 %v808_v22  ;;  %837 = vmatprep.subr.bf16.mxu1 %v808_v22  ;;  %v820_v33 = vpack.c.bf16 %v358_v32, %v357_v31  ;;  %v824_v36 = vpack.c.bf16 %v360_v35, %v359_v34  ;;  %v361_v37 = vld [vmem:[%s1200_s20 + $0x60] sm:$0xff]  ;;  %v363_v40 = vld [vmem:[%s1200_s20 + $0x70] sm:$0xff]  ;;  %v364_v41 = vld [vmem:[%s1200_s20 + $0x78] sm:$0xff] }
  0x45   : > { %780 = vmatprep.mubr.f32.mxu0 %v333_v26  ;;  %792 = vmatprep.mubr.f32.mxu1 %v341_v27  ;;  %v828_v39 = vpack.c.bf16 %v362_v38, %v361_v37  ;;  %v832_v42 = vpack.c.bf16 %v364_v41, %v363_v40  ;;  %v334_v43 = vld [vmem:[%s1202_s24 + $0x8] sm:$0xff]  ;;  %v335_v45 = vld [vmem:[%s1202_s24 + $0x10] sm:$0xff]  ;;  %v336_v47 = vld [vmem:[%s1202_s24 + $0x18] sm:$0xff] }
  0x46   : > { %v342_v44 = vld [vmem:[%s1202_s24 + $0x48] sm:$0xff]  ;;  %v343_v46 = vld [vmem:[%s1202_s24 + $0x50] sm:$0xff]  ;;  %v344_v48 = vld [vmem:[%s1202_s24 + $0x58] sm:$0xff] }
  0x47   : > { %811 = vmatpush3.bf16.msra.mxu0 %v808_v22  ;;  %845 = vmatpush3.bf16.msra.mxu1 %v808_v22  ;;  %v337_v49 = vld [vmem:[%s1202_s24 + $0x20] sm:$0xff]  ;;  %v338_v51 = vld [vmem:[%s1202_s24 + $0x28] sm:$0xff]  ;;  %v339_v53 = vld [vmem:[%s1202_s24 + $0x30] sm:$0xff] }
  0x48   : > { %813 = vmatprep.subr.bf16.mxu0 %v812_v25  ;;  %838 = vmatprep.subr.bf16.mxu1 %v812_v25  ;;  %v345_v50 = vld [vmem:[%s1202_s24 + $0x60] sm:$0xff]  ;;  %v346_v52 = vld [vmem:[%s1202_s24 + $0x68] sm:$0xff]  ;;  %v347_v54 = vld [vmem:[%s1202_s24 + $0x70] sm:$0xff] }
  0x49   : > { %v340_v55 = vld [vmem:[%s1202_s24 + $0x38] sm:$0xff]  ;;  %v318_v57 = vld [vmem:[#allocation2 + $0x8] sm:$0xff]  ;;  %v317_v59 = vld [vmem:[#allocation2] sm:$0xff] }
  0x4a   : > { %v348_v56 = vld [vmem:[%s1202_s24 + $0x78] sm:$0xff]  ;;  %v326_v58 = vld [vmem:[#allocation2 + $0x48] sm:$0xff]  ;;  %v325_v60 = vld [vmem:[#allocation2 + $0x40] sm:$0xff] }
  0x4b   : > { %815 = vmatpush3.bf16.msra.mxu0 %v812_v25  ;;  %846 = vmatpush3.bf16.msra.mxu1 %v812_v25  ;;  %v320_v5 = vld [vmem:[#allocation2 + $0x18] sm:$0xff]  ;;  %v319_v7 = vld [vmem:[#allocation2 + $0x10] sm:$0xff]  ;;  %v322_v17 = vld [vmem:[#allocation2 + $0x28] sm:$0xff] }
  0x4c   : > { %817 = vmatprep.subr.bf16.mxu0 %v816_v30  ;;  %839 = vmatprep.subr.bf16.mxu1 %v816_v30  ;;  %v328_v6 = vld [vmem:[#allocation2 + $0x58] sm:$0xff]  ;;  %v327_v8 = vld [vmem:[#allocation2 + $0x50] sm:$0xff]  ;;  %v330_v18 = vld [vmem:[#allocation2 + $0x68] sm:$0xff] }
  0x4d   : > { %v321_v19 = vld [vmem:[#allocation2 + $0x20] sm:$0xff]  ;;  %v324_v29 = vld [vmem:[#allocation2 + $0x38] sm:$0xff]  ;;  %v323_v31 = vld [vmem:[#allocation2 + $0x30] sm:$0xff] }
  0x4e   : > { %v329_v20 = vld [vmem:[#allocation2 + $0x60] sm:$0xff]  ;;  %v331_v32 = vld [vmem:[#allocation2 + $0x70] sm:$0xff] }
  0x4f   : > { %819 = vmatpush3.bf16.msra.mxu0 %v816_v30  ;;  %847 = vmatpush3.bf16.msra.mxu1 %v816_v30  ;;  %v332_v30 = vld [vmem:[#allocation2 + $0x78] sm:$0xff] }
  0x50   : > { %821 = vmatprep.subr.bf16.mxu0 %v820_v33  ;;  %840 = vmatprep.subr.bf16.mxu1 %v820_v33 }
  0x53   : > { %823 = vmatpush3.bf16.msra.mxu0 %v820_v33  ;;  %848 = vmatpush3.bf16.msra.mxu1 %v820_v33 }
  0x54   : > { %825 = vmatprep.subr.bf16.mxu0 %v824_v36  ;;  %841 = vmatprep.subr.bf16.mxu1 %v824_v36 }
  0x57   : > { %827 = vmatpush3.bf16.msra.mxu0 %v824_v36  ;;  %849 = vmatpush3.bf16.msra.mxu1 %v824_v36 }
  0x58   : > { %829 = vmatprep.subr.bf16.mxu0 %v828_v39  ;;  %842 = vmatprep.subr.bf16.mxu1 %v828_v39 }
  0x5b   : > { %831 = vmatpush3.bf16.msra.mxu0 %v828_v39  ;;  %850 = vmatpush3.bf16.msra.mxu1 %v828_v39 }
  0x5c   : > { %833 = vmatprep.subr.bf16.mxu0 %v832_v42  ;;  %843 = vmatprep.subr.bf16.mxu1 %v832_v42 }
  0x5f   : > { %835 = vmatpush3.bf16.msra.mxu0 %v832_v42  ;;  %851 = vmatpush3.bf16.msra.mxu1 %v832_v42 }
  0x62   : > { %781 = vmatmul.mubr.f32.vlgmr.msra.gmra.mrb[0].mxu0 %v334_v43  ;;  %793 = vmatmul.mubr.f32.vlgmr.msra.gmra.mrb[0].mxu1 %v342_v44 }
  0x63   : > { %783 = vmatprep.mubr.f32.mxu0 %v335_v45  ;;  %795 = vmatprep.mubr.f32.mxu1 %v343_v46 }
  0x66   : > { %784 = vmatmul.mubr.f32.gmra.mrb[2].mxu0 %v336_v47  ;;  %796 = vmatmul.mubr.f32.gmra.mrb[2].mxu1 %v344_v48 }
  0x67   : > { %786 = vmatprep.mubr.f32.mxu0 %v337_v49  ;;  %798 = vmatprep.mubr.f32.mxu1 %v345_v50 }
  0x6a   : > { %787 = vmatmul.mubr.f32.gmra.mrb[4].mxu0 %v338_v51  ;;  %799 = vmatmul.mubr.f32.gmra.mrb[4].mxu1 %v346_v52 }
  0x6b   : > { %789 = vmatprep.mubr.f32.mxu0 %v339_v53  ;;  %801 = vmatprep.mubr.f32.mxu1 %v347_v54 }
  0x6e   : > { %790 = vmatmul.mubr.f32.gmra.mrb[6].mxu0 %v340_v55  ;;  %802 = vmatmul.mubr.f32.gmra.mrb[6].mxu1 %v348_v56 }
 0x135   : > { %v782_v61 = vpop.f32.mrb[0].mxu0  ;;  %v794_v62 = vpop.f32.mrb[0].mxu1 }
 0x136   : > { %v511_v63 = vadd.f32 %v782_v61, %v318_v57  ;;  %v519_v0 = vadd.f32 %v794_v62, %v326_v58  ;;  %v431_v1 = vpop.f32.mrb[1].mxu0  ;;  %v471_v2 = vpop.f32.mrb[1].mxu1 }
 0x137   : > { %v510_v3 = vadd.f32 %v431_v1, %v317_v59  ;;  %v518_v4 = vadd.f32 %v471_v2, %v325_v60 }
 0x138   : > { %527 = vst [vmem:[#allocation2 + $0x8] sm:$0xff] %v511_v63  ;;  %535 = vst [vmem:[#allocation2 + $0x48] sm:$0xff] %v519_v0 }
 0x139   : > { %526 = vst [vmem:[#allocation2] sm:$0xff] %v510_v3  ;;  %534 = vst [vmem:[#allocation2 + $0x40] sm:$0xff] %v518_v4  ;;  %v785_v9 = vpop.f32.mrb[2].mxu0  ;;  %v797_v10 = vpop.f32.mrb[2].mxu1 }
 0x13a   : > { %v513_v11 = vadd.f32 %v785_v9, %v320_v5  ;;  %v521_v12 = vadd.f32 %v797_v10, %v328_v6  ;;  %v441_v13 = vpop.f32.mrb[3].mxu0  ;;  %v481_v14 = vpop.f32.mrb[3].mxu1 }
 0x13b   : > { %v512_v15 = vadd.f32 %v441_v13, %v319_v7  ;;  %v520_v16 = vadd.f32 %v481_v14, %v327_v8 }
 0x13c   : > { %529 = vst [vmem:[#allocation2 + $0x18] sm:$0xff] %v513_v11  ;;  %537 = vst [vmem:[#allocation2 + $0x58] sm:$0xff] %v521_v12 }
 0x13d   : > { %528 = vst [vmem:[#allocation2 + $0x10] sm:$0xff] %v512_v15  ;;  %536 = vst [vmem:[#allocation2 + $0x50] sm:$0xff] %v520_v16  ;;  %v788_v21 = vpop.f32.mrb[4].mxu0  ;;  %v800_v22 = vpop.f32.mrb[4].mxu1 }
 0x13e   : > { %v515_v23 = vadd.f32 %v788_v21, %v322_v17  ;;  %v523_v24 = vadd.f32 %v800_v22, %v330_v18  ;;  %v451_v25 = vpop.f32.mrb[5].mxu0  ;;  %v491_v26 = vpop.f32.mrb[5].mxu1 }
 0x13f   : > { %v514_v27 = vadd.f32 %v451_v25, %v321_v19  ;;  %v522_v28 = vadd.f32 %v491_v26, %v329_v20  ;;  %545 = sbr.rel (%p708_p5) target bundleno = 335 (0x14f), region = 74  ;;  %v547_v42 = vld [vmem:[#allocation2 + $0x8] sm:$0xff] (!%p708_p5) }
 0x140   : > { %531 = vst [vmem:[#allocation2 + $0x28] sm:$0xff] %v515_v23  ;;  %539 = vst [vmem:[#allocation2 + $0x68] sm:$0xff] %v523_v24  ;;  %v546_v41 = vld [vmem:[#allocation2] sm:$0xff] (!%p708_p5)  ;;  %v555_v50 = vld [vmem:[#allocation2 + $0x48] sm:$0xff] (!%p708_p5) }
 0x141   : > { %530 = vst [vmem:[#allocation2 + $0x20] sm:$0xff] %v514_v27  ;;  %538 = vst [vmem:[#allocation2 + $0x60] sm:$0xff] %v522_v28  ;;  %v791_v33 = vpop.f32.mrb[6].mxu0  ;;  %v803_v34 = vpop.f32.mrb[6].mxu1  ;;  %v554_v49 = vld [vmem:[#allocation2 + $0x40] sm:$0xff] (!%p708_p5) }
 0x142   : > { %v517_v35 = vadd.f32 %v791_v33, %v324_v29  ;;  %v525_v36 = vadd.f32 %v803_v34, %v332_v30  ;;  %v461_v37 = vpop.f32.mrb[7].mxu0  ;;  %v501_v38 = vpop.f32.mrb[7].mxu1  ;;  %562 = vst [vmem:[%s1204_s26] sm:$0xff] (!%p708_p5), %v546_v41  ;;  %563 = vst [vmem:[%s1204_s26 + $0x8] sm:$0xff] (!%p708_p5), %v547_v42 }
 0x143   : > { %v516_v39 = vadd.f32 %v461_v37, %v323_v31  ;;  %v524_v40 = vadd.f32 %v501_v38, %v331_v32  ;;  %v549_v44 = vld [vmem:[#allocation2 + $0x18] sm:$0xff] (!%p708_p5)  ;;  %570 = vst [vmem:[%s1204_s26 + $0x40] sm:$0xff] (!%p708_p5), %v554_v49  ;;  %571 = vst [vmem:[%s1204_s26 + $0x48] sm:$0xff] (!%p708_p5), %v555_v50 }
 0x144   : > { %533 = vst [vmem:[#allocation2 + $0x38] sm:$0xff] %v517_v35  ;;  %541 = vst [vmem:[#allocation2 + $0x78] sm:$0xff] %v525_v36  ;;  %v548_v43 = vld [vmem:[#allocation2 + $0x10] sm:$0xff] (!%p708_p5)  ;;  %v557_v52 = vld [vmem:[#allocation2 + $0x58] sm:$0xff] (!%p708_p5) }
 0x145   : > { %532 = vst [vmem:[#allocation2 + $0x30] sm:$0xff] %v516_v39  ;;  %540 = vst [vmem:[#allocation2 + $0x70] sm:$0xff] %v524_v40  ;;  %v556_v51 = vld [vmem:[#allocation2 + $0x50] sm:$0xff] (!%p708_p5) }
 0x146   : > { %564 = vst [vmem:[%s1204_s26 + $0x10] sm:$0xff] %v548_v43  ;;  %565 = vst [vmem:[%s1204_s26 + $0x18] sm:$0xff] %v549_v44 }
 0x147   : > { %v551_v46 = vld [vmem:[#allocation2 + $0x28] sm:$0xff]  ;;  %572 = vst [vmem:[%s1204_s26 + $0x50] sm:$0xff] %v556_v51  ;;  %573 = vst [vmem:[%s1204_s26 + $0x58] sm:$0xff] %v557_v52 }
 0x148   : > { %v550_v45 = vld [vmem:[#allocation2 + $0x20] sm:$0xff]  ;;  %567 = vst [vmem:[%s1204_s26 + $0x28] sm:$0xff] %v551_v46  ;;  %v559_v54 = vld [vmem:[#allocation2 + $0x68] sm:$0xff] }
 0x149   : > { %566 = vst [vmem:[%s1204_s26 + $0x20] sm:$0xff] %v550_v45  ;;  %v558_v53 = vld [vmem:[#allocation2 + $0x60] sm:$0xff]  ;;  %575 = vst [vmem:[%s1204_s26 + $0x68] sm:$0xff] %v559_v54 }
 0x14a   : > { %574 = vst [vmem:[%s1204_s26 + $0x60] sm:$0xff] %v558_v53 }
 0x14b   : > { %v553_v48 = vld [vmem:[#allocation2 + $0x38] sm:$0xff] }
 0x14c   : > { %v552_v47 = vld [vmem:[#allocation2 + $0x30] sm:$0xff]  ;;  %569 = vst [vmem:[%s1204_s26 + $0x38] sm:$0xff] %v553_v48  ;;  %v561_v56 = vld [vmem:[#allocation2 + $0x78] sm:$0xff] }
 0x14d   : > { %568 = vst [vmem:[%s1204_s26 + $0x30] sm:$0xff] %v552_v47  ;;  %v560_v55 = vld [vmem:[#allocation2 + $0x70] sm:$0xff]  ;;  %577 = vst [vmem:[%s1204_s26 + $0x78] sm:$0xff] %v561_v56 }
 0x14e   : > { %576 = vst [vmem:[%s1204_s26 + $0x70] sm:$0xff] %v560_v55 }
 0x14f PF: > { %s715_s12 = sshll.u32 %s1040_s15, 11  ;;  %s593_s29 = sshll.u32 %s1204_s26, 4  ;;  %s1263_s29 = int_to_ptr.vmem [resolvable:$true] %s593_s29 }
 0x150   : > { %s1260_s25 = scalar_lea.hbm %s1327_s2, %s715_s12  ;;  %s1267_s5 = scalar_lea.sflag [#allocation5], %s283_s28 }
 0x151   : > { %s942_s6 = scalar_lea.vmem %s1263_s29, 2048  ;;  %s1055_s15 = smov [#allocation4]  }
 0x152   : > { %p943_p6 = scmp.ne.s32.totalorder %s1263_s29, %s942_s6  ;;  %s946_s7 = sshll.u32 %s1055_s15, 4  ;;  %s947_s7 = int_to_ptr.vmem [resolvable:$false] %s946_s7 }
 0x153   : > { %s948_s8 = scalar_lea.vmem %s947_s7, 4096  ;;  %p949_p10 = scmp.lt.s32.totalorder %s1263_s29, %s947_s7 }
 0x154   : > { %p944_p8 = pnand %p943_p6, %p1145_p7  ;;  %p950_p11 = scmp.lt.s32.totalorder %s948_s8, %s942_s6 }
 0x156   : > { %p945_p9 = pneg %p944_p8  ;;  %p951_p13 = por %p950_p11, %p949_p10 }
 0x158   : > { %p952_p0 = pnand %p951_p13, %p945_p9 }
 0x15a   : > { %955 = shalt.err (!%p952_p0)
}
 0x15b   : > { %s956_s28 = scalar_lea.hbm %s1260_s25, 2048  ;;  %s960_s24 = scalar_lea.hbm %s1327_s2, 4096 }
 0x15c   : > { %p957_p1 = scmp.ne.s32.totalorder %s1260_s25, %s956_s28  ;;  %p961_p4 = scmp.lt.u32.totalorder %s1260_s25, %s1327_s2 }
 0x15d   : > { %p962_p5 = scmp.lt.u32.totalorder %s960_s24, %s956_s28  ;;  %p964_p8 = scmp.lt.u32.totalorder %s956_s28, %s1260_s25 }
 0x15e   : > { %p958_p2 = pnand %p957_p1, %p1145_p7 }
 0x15f   : > { %p963_p6 = por %p962_p5, %p961_p4 }
 0x160   : > { %p959_p3 = pneg %p958_p2 }
 0x161   : > { %p965_p9 = por %p964_p8, %p963_p6 }
 0x163   : > { %p966_p10 = pnand %p965_p9, %p959_p3 }
 0x165   : > { %969 = shalt.err (!%p966_p10)
}
 0x166   : > { %s1056_s14 = smov 128   ;;  %s1057_s23 = smov 8  }
 0x167   : > { %852 = dma.vmem_to_hbm [thread:$0]  (%p1145_p7), %s1263_s29, 2048, %s1260_s25, %s1267_s5, %s1056_s14, %s1056_s14, %s1057_s23  }
 0x168 PF: > { %p858_p11 = scmp.ge.s32.totalorder %s1052_s18, 2  ;;  %s608_s6 = sand.u32 1, %s1016_s9  }
 0x169   : > { %s609_s15 = scalar_lea.sflag [#allocation5], %s608_s6 }
 0x16a   : > { %p855_p13 = pnand %p858_p11, %p1153_p12 }
 0x16c   : > { %1011 = dma.done.wait (!%p855_p13), %s609_s15, 2048  }
 0x16d   : > { %1013 = vsyncadd (!%p855_p13), %s609_s15, 4294965248  ;;  %s15_s18 = sadd.s32 1, %s1052_s18   ;;  %s1331_s9 = smov %s1020_s10 }
 0x16e   : > { %p12_p0 = scmp.ge.s32.totalorder %s15_s18, 6   ;;  %s1332_s10 = smov %s1024_s11 }
 0x16f   : > { %s1333_s11 = smov %s1158_s3  ;;  %s1334_s12 = smov %s1032_s13 }
 0x170   : > { %s1335_s13 = smov %s1161_s4  ;;  %s1336_s14 = smov %s1044_s16 }
 0x171   : > { %s1337_s15 = smov %s1048_s17  ;;  %s1338_s16 = smov %s1341_s21 }
 0x172   : > { %s1339_s17 = smov %s1345_s22  ;;  %14 = sbr.rel (!%p12_p0) target bundleno = 6 (0x6), region = 117 }
 0x179   :  { %614 = vsyncpa [#allocation5], 1 }
 0x17a   :  { %616 = vsyncpa [#allocation5 + $0x1], 1 }

</bundles_post_ra>
